<compile_context>
chip_gen: v5e
topology: v5e:2x2
jax: 0.10.0
libtpu: 0.0.40
codegen_flags: <defaults>
</compile_context>

<pallas_src>
import functools
import math

import jax
import jax.numpy as jnp
from jax.experimental import pallas as pl
from jax.experimental.pallas import tpu as pltpu


# ----------------------------------------------------------------------------- helpers

# Fits v7x's 64 MiB physical VMEM with headroom; well above v5e's 16 MiB scoped default.
_VMEM_LIMIT = 48 * 1024 * 1024


def _round_up(x, m):
    return ((x + m - 1) // m) * m


def _pick_tile(dim, target, align):
    """Largest tile <= target that is a multiple of `align` and divides `dim`;
    falls back to the full dim (always a legal block shape)."""
    if dim <= target:
        return dim
    t = (target // align) * align
    while t >= align:
        if dim % t == 0:
            return t
        t -= align
    return dim


def _gelu(y):
    # exact (erf-based) GELU, matching torch.nn.functional.gelu default
    return 0.5 * y * (1.0 + jax.lax.erf(y * (1.0 / math.sqrt(2.0))))


# ----------------------------------------------------------------------------- kernels

def _linear_kernel(x_ref, w_ref, b_ref, o_ref, acc_ref, *, apply_gelu):
    k = pl.program_id(2)

    @pl.when(k == 0)
    def _():
        acc_ref[...] = jnp.zeros_like(acc_ref)

    acc_ref[...] += jnp.dot(x_ref[...], w_ref[...], preferred_element_type=jnp.float32)

    @pl.when(k == pl.num_programs(2) - 1)
    def _():
        y = acc_ref[...] + b_ref[...]
        if apply_gelu:
            y = _gelu(y)
        o_ref[...] = y.astype(o_ref.dtype)


def linear(x2d, w, b, apply_gelu=False, out_dtype=jnp.bfloat16):
    """y = x2d @ w + b (optionally fused exact GELU).  bf16 operands, f32 accumulation."""
    M, K = x2d.shape
    K2, Nf = w.shape
    assert K == K2

    # Guard the full-dim fallback: a non-128-multiple output dim (e.g. a real vocab size)
    # is padded to a lane-aligned size so tn stays small, then the result is sliced back.
    Nf_p = Nf
    if Nf > 128 and Nf % 128 != 0:
        Nf_p = _round_up(Nf, 512 if Nf > 512 else 128)
        w = jnp.pad(w, ((0, 0), (0, Nf_p - Nf)))
        b = jnp.pad(b, ((0, Nf_p - Nf),))

    x = x2d.astype(jnp.bfloat16)
    wbf = w.astype(jnp.bfloat16)
    b2 = b.reshape(1, Nf_p).astype(jnp.float32)

    tm = _pick_tile(M, 512, 16)
    tn = _pick_tile(Nf_p, 512, 128)
    tk = _pick_tile(K, 512, 128)
    grid = (M // tm, Nf_p // tn, K // tk)

    out_isz = jnp.dtype(out_dtype).itemsize
    out = pl.pallas_call(
        functools.partial(_linear_kernel, apply_gelu=apply_gelu),
        out_shape=jax.ShapeDtypeStruct((M, Nf_p), out_dtype),
        grid=grid,
        in_specs=[
            pl.BlockSpec((tm, tk), lambda i, j, k: (i, k)),
            pl.BlockSpec((tk, tn), lambda i, j, k: (k, j)),
            pl.BlockSpec((1, tn), lambda i, j, k: (0, j)),
        ],
        out_specs=pl.BlockSpec((tm, tn), lambda i, j, k: (i, j)),
        scratch_shapes=[pltpu.VMEM((tm, tn), jnp.float32)],
        compiler_params=pltpu.CompilerParams(
            dimension_semantics=("parallel", "parallel", "arbitrary"),
            vmem_limit_bytes=_VMEM_LIMIT),
        cost_estimate=pl.CostEstimate(
            flops=2 * M * K * Nf_p,
            transcendentals=M * Nf_p if apply_gelu else 0,
            bytes_accessed=2 * M * K + 2 * K * Nf_p + out_isz * M * Nf_p + 4 * Nf_p),
    )(x, wbf, b2)
    if Nf_p != Nf:
        out = out[:, :Nf]
    return out


def _linear_ln_kernel(*refs, apply_gelu, eps, has_residual):
    if has_residual:
        x_ref, w_ref, b_ref, res_ref, g_ref, be_ref, o_ref, acc_ref = refs
    else:
        x_ref, w_ref, b_ref, g_ref, be_ref, o_ref, acc_ref = refs
        res_ref = None
    k = pl.program_id(1)

    @pl.when(k == 0)
    def _():
        acc_ref[...] = jnp.zeros_like(acc_ref)

    acc_ref[...] += jnp.dot(x_ref[...], w_ref[...], preferred_element_type=jnp.float32)

    @pl.when(k == pl.num_programs(1) - 1)
    def _():
        y = acc_ref[...] + b_ref[...]
        if apply_gelu:
            y = _gelu(y)
        if has_residual:
            y = y + res_ref[...].astype(jnp.float32)
        mean = jnp.mean(y, axis=-1, keepdims=True)
        var = jnp.mean(jnp.square(y - mean), axis=-1, keepdims=True)
        yn = (y - mean) * jax.lax.rsqrt(var + eps)
        o_ref[...] = (yn * g_ref[...] + be_ref[...]).astype(o_ref.dtype)


def linear_ln(x2d, w, b, gamma, beta, eps, residual=None, apply_gelu=False,
              out_dtype=jnp.bfloat16):
    """Fused: (x2d @ w + b) [-> GELU] [+ residual] -> LayerNorm.  N (feature) dim untiled
    so the LN row statistics stay in-kernel; K tiled with an f32 accumulator."""
    M, K = x2d.shape
    K2, Nf = w.shape
    assert K == K2
    x = x2d.astype(jnp.bfloat16)
    wbf = w.astype(jnp.bfloat16)
    b2 = b.reshape(1, Nf).astype(jnp.float32)
    g2 = gamma.reshape(1, Nf).astype(jnp.float32)
    be2 = beta.reshape(1, Nf).astype(jnp.float32)

    tm = _pick_tile(M, 512, 16)
    tk = _pick_tile(K, 512, 128)
    grid = (M // tm, K // tk)

    in_specs = [
        pl.BlockSpec((tm, tk), lambda i, k: (i, k)),
        pl.BlockSpec((tk, Nf), lambda i, k: (k, 0)),
        pl.BlockSpec((1, Nf), lambda i, k: (0, 0)),
    ]
    inputs = [x, wbf, b2]
    has_res = residual is not None
    if has_res:
        in_specs.append(pl.BlockSpec((tm, Nf), lambda i, k: (i, 0)))
        inputs.append(residual.astype(jnp.bfloat16))
    in_specs += [pl.BlockSpec((1, Nf), lambda i, k: (0, 0)),
                 pl.BlockSpec((1, Nf), lambda i, k: (0, 0))]
    inputs += [g2, be2]

    return pl.pallas_call(
        functools.partial(_linear_ln_kernel, apply_gelu=apply_gelu, eps=eps,
                          has_residual=has_res),
        out_shape=jax.ShapeDtypeStruct((M, Nf), out_dtype),
        grid=grid,
        in_specs=in_specs,
        out_specs=pl.BlockSpec((tm, Nf), lambda i, k: (i, 0)),
        scratch_shapes=[pltpu.VMEM((tm, Nf), jnp.float32)],
        compiler_params=pltpu.CompilerParams(
            dimension_semantics=("parallel", "arbitrary"),
            vmem_limit_bytes=_VMEM_LIMIT),
        cost_estimate=pl.CostEstimate(
            flops=2 * M * K * Nf + 10 * M * Nf,
            transcendentals=M * Nf if apply_gelu else 0,
            bytes_accessed=2 * M * K + 2 * K * Nf + 2 * M * Nf * (2 if has_res else 1)
                           + 2 * M * Nf),
    )(*inputs)


def _embed_ln_kernel(x_ref, pos_ref, g_ref, b_ref, o_ref, *, eps):
    y = x_ref[0] + pos_ref[...]
    mean = jnp.mean(y, axis=-1, keepdims=True)
    var = jnp.mean(jnp.square(y - mean), axis=-1, keepdims=True)
    yn = (y - mean) * jax.lax.rsqrt(var + eps)
    o_ref[0] = (yn * g_ref[...] + b_ref[...]).astype(o_ref.dtype)


def embed_add_layernorm(x3d, pos, gamma, beta, eps, out_dtype=jnp.bfloat16):
    """Fused (x + pos[None, :, :]) -> row-wise LayerNorm.  x3d: (N, S, E); pos: (S, E).
    Returns (N*S, E) in batch-major row order."""
    N, S, E = x3d.shape
    g2 = gamma.reshape(1, E).astype(jnp.float32)
    b2 = beta.reshape(1, E).astype(jnp.float32)
    ts = _pick_tile(S, 256, 8)
    out = pl.pallas_call(
        functools.partial(_embed_ln_kernel, eps=eps),
        out_shape=jax.ShapeDtypeStruct((N, S, E), out_dtype),
        grid=(N, S // ts),
        in_specs=[
            pl.BlockSpec((1, ts, E), lambda n, s: (n, s, 0)),
            pl.BlockSpec((ts, E), lambda n, s: (s, 0)),
            pl.BlockSpec((1, E), lambda n, s: (0, 0)),
            pl.BlockSpec((1, E), lambda n, s: (0, 0)),
        ],
        out_specs=pl.BlockSpec((1, ts, E), lambda n, s: (n, s, 0)),
        compiler_params=pltpu.CompilerParams(
            dimension_semantics=("parallel", "parallel"),
            vmem_limit_bytes=_VMEM_LIMIT),
    )(x3d.astype(jnp.float32), pos.astype(jnp.float32), g2, b2)
    return out.reshape(N * S, E)


def _attn_kernel(qkv_ref, o_ref, *, nhead, scale):
    x = qkv_ref[0]                               # (S, 3E) bf16, all heads of one batch element
    E = x.shape[1] // 3
    Dh = E // nhead
    for h in range(nhead):                       # static unroll over heads
        qh = x[:, h * Dh:(h + 1) * Dh]                       # bf16 (S, Dh)
        kh = x[:, E + h * Dh:E + (h + 1) * Dh]               # bf16 (S, Dh)
        vh = x[:, 2 * E + h * Dh:2 * E + (h + 1) * Dh]       # bf16 (S, Dh)
        # QK^T via dot_general (contract dim 1 of both) -> no explicit kh transpose.
        s = jax.lax.dot_general(qh, kh, (((1,), (1,)), ((), ())),
                                preferred_element_type=jnp.float32)
        s = s * scale                                        # scale in f32 on the scores
        m = jnp.max(s, axis=-1, keepdims=True)
        p = jnp.exp(s - m)
        inv = pl.reciprocal(jnp.sum(p, axis=-1, keepdims=True), approx=True)
        p = p * inv
        # store this head's output directly -> no concatenate / no nhead-wide live set
        o_ref[0, :, h * Dh:(h + 1) * Dh] = jnp.dot(
            p.astype(vh.dtype), vh, preferred_element_type=jnp.float32).astype(o_ref.dtype)


def multihead_attention(qkv_2d, N, S, E, nhead):
    """Scaled-dot-product multi-head attention from a fused QKV slab.
    qkv_2d: (N*S, 3E) bf16, batch-major rows -> (N*S, E) bf16, batch-major rows."""
    qkv = qkv_2d.reshape(N, S, 3 * E)            # free view (no transpose)
    scale = 1.0 / math.sqrt(E // nhead)
    out = pl.pallas_call(
        functools.partial(_attn_kernel, nhead=nhead, scale=scale),
        out_shape=jax.ShapeDtypeStruct((N, S, E), jnp.bfloat16),
        grid=(N,),
        in_specs=[pl.BlockSpec((1, S, 3 * E), lambda b: (b, 0, 0))],
        out_specs=pl.BlockSpec((1, S, E), lambda b: (b, 0, 0)),
        compiler_params=pltpu.CompilerParams(
            dimension_semantics=("parallel",),
            vmem_limit_bytes=_VMEM_LIMIT),
        cost_estimate=pl.CostEstimate(
            flops=4 * N * S * S * E,
            transcendentals=nhead * N * S * S,
            bytes_accessed=2 * (N * S * 3 * E + N * S * E)),
    )(qkv)
    return out.reshape(N * S, E)


# ----------------------------------------------------------------------------- model

def encoder_layer_forward(x2, p, nhead, N, S, E):
    """One TransformerEncoderLayer (post-norm, GELU FFN).  x2: (N*S, E) bf16, batch-major."""
    qkv = linear(x2, p["wqkv"], p["bqkv"])                       # fused Q/K/V projection
    attn = multihead_attention(qkv, N, S, E, nhead)
    # out-proj + residual + norm1 fused  (dropout1 -> identity, eval)
    x2 = linear_ln(attn, p["wo"], p["bo"], p["norm1_g"], p["norm1_b"], 1e-5, residual=x2)
    # FFN: linear1 + GELU fused, then linear2 + residual + norm2 fused (dropouts -> identity)
    h = linear(x2, p["w1"], p["b1"], apply_gelu=True)
    x2 = linear_ln(h, p["w2"], p["b2"], p["norm2_g"], p["norm2_b"], 1e-5, residual=x2)
    return x2


def mlm_task_forward(params, src, token_type_input=None):
    """src: (N, S) int32 token ids (batch-first) -> logits (S, N, ntoken) float32."""
    N, S = src.shape
    E = params["embed"].shape[1]

    # --- BertEmbedding (batch-major rows): token + positional + token-type embeddings,
    #     sum fused with LayerNorm in one kernel (dropout = identity, eval).
    tok = jnp.take(params["embed"], src, axis=0)                 # (N, S, E) f32
    pos = params["pos_embed"][:S]                                # (S, E)
    if token_type_input is None:
        # token type 0 everywhere -> a single (E,) row added at every position
        pos = pos + params["tok_type_embed"][0][None, :]
    else:
        tt_idx = token_type_input.T                              # torch passes (S, N)
        tok = tok + jnp.take(params["tok_type_embed"], tt_idx, axis=0)
    x2 = embed_add_layernorm(tok, pos, params["embed_norm_g"], params["embed_norm_b"], 1e-5)

    # --- Transformer encoder stack (all batch-major; no per-layer transposes)
    for lp in params["layers"]:
        x2 = encoder_layer_forward(x2, lp, params["nhead"], N, S, E)

    # --- MLM head: Linear -> GELU -> LayerNorm(eps=1e-12) fused
    x2 = linear_ln(x2, params["mlm_span_w"], params["mlm_span_b"],
                   params["head_norm_g"], params["head_norm_b"], 1e-12, apply_gelu=True)

    # Restore (S, N, ...) output order with ONE small E-wide transpose before the vocab matmul.
    x_sn = jnp.transpose(x2.reshape(N, S, E), (1, 0, 2)).reshape(S * N, E)
    logits = linear(x_sn, params["mlm_head_w"], params["mlm_head_b"], out_dtype=jnp.float32)
    ntoken = params["mlm_head_w"].shape[1]
    return logits.reshape(S, N, ntoken)


# ----------------------------------------------------------------------------- params

def init_params(key, ntoken, ninp, nhead, nhid, nlayers, max_len=5000):
    def normal(k, shape, std=0.02):
        return jax.random.normal(k, shape, jnp.float32) * std

    keys = jax.random.split(key, 6 + nlayers)
    params = {
        "nhead": nhead,
        "embed": normal(keys[0], (ntoken, ninp), 1.0),
        "pos_embed": normal(keys[1], (max_len, ninp), 1.0),
        "tok_type_embed": normal(keys[2], (2, ninp), 1.0),
        "embed_norm_g": jnp.ones((ninp,), jnp.float32),
        "embed_norm_b": jnp.zeros((ninp,), jnp.float32),
        "mlm_span_w": normal(keys[3], (ninp, ninp)),
        "mlm_span_b": jnp.zeros((ninp,), jnp.float32),
        "head_norm_g": jnp.ones((ninp,), jnp.float32),
        "head_norm_b": jnp.zeros((ninp,), jnp.float32),
        "mlm_head_w": normal(keys[4], (ninp, ntoken)),
        "mlm_head_b": jnp.zeros((ntoken,), jnp.float32),
        "layers": [],
    }
    for li in range(nlayers):
        lk = jax.random.split(keys[5 + li], 6)
        wq, wk, wv = (normal(lk[0], (ninp, ninp)), normal(lk[1], (ninp, ninp)),
                      normal(lk[2], (ninp, ninp)))
        params["layers"].append({
            # fused QKV projection weight/bias
            "wqkv": jnp.concatenate([wq, wk, wv], axis=1),
            "bqkv": jnp.zeros((3 * ninp,), jnp.float32),
            "wo": normal(lk[3], (ninp, ninp)), "bo": jnp.zeros((ninp,), jnp.float32),
            "w1": normal(lk[4], (ninp, nhid)), "b1": jnp.zeros((nhid,), jnp.float32),
            "w2": normal(lk[5], (nhid, ninp)), "b2": jnp.zeros((ninp,), jnp.float32),
            "norm1_g": jnp.ones((ninp,), jnp.float32), "norm1_b": jnp.zeros((ninp,), jnp.float32),
            "norm2_g": jnp.ones((ninp,), jnp.float32), "norm2_b": jnp.zeros((ninp,), jnp.float32),
        })
    return params


# ----------------------------------------------------------------------------- main

if __name__ == "__main__":
    ntoken, ninp, nhead, nhid, nlayers = 128, 32, 4, 64, 2
    N, S = 2, 8  # batch, sequence length

    key = jax.random.PRNGKey(0)
    pkey, dkey = jax.random.split(key)
    params = init_params(pkey, ntoken, ninp, nhead, nhid, nlayers)

    src = jax.random.randint(dkey, (N, S), 0, ntoken, dtype=jnp.int32)   # (N, S) tokens

    out = mlm_task_forward(params, src, token_type_input=None)
    out = jax.block_until_ready(out)

    assert out.shape == (S, N, ntoken), out.shape
    assert out.dtype == jnp.float32
    assert bool(jnp.all(jnp.isfinite(out)))
    print("KERNEL_OK")
</pallas_src>

<mosaic_0001>
module attributes {stable_mosaic.version = 11 : i64} {
  func.func @_embed_ln_kernel(%arg0: i32, %arg1: i32, %arg2: memref<1x8x32xf32, #tpu.memory_space<vmem>>, %arg3: memref<8x32xf32, #tpu.memory_space<vmem>>, %arg4: memref<1x32xf32, #tpu.memory_space<vmem>>, %arg5: memref<1x32xf32, #tpu.memory_space<vmem>>, %arg6: memref<1x8x32xbf16, #tpu.memory_space<vmem>>) attributes {dimension_semantics = [#tpu.dimension_semantics<parallel>, #tpu.dimension_semantics<parallel>], iteration_bounds = array<i64: 2, 1>, scalar_prefetch = 0 : i64, scratch_operands = 0 : i64, tpu.core_type = #tpu.core_type<tc>, window_params = [{transform_indices = @transform_0, window_bounds = array<i64: 1, 8, 32>}, {transform_indices = @transform_1, window_bounds = array<i64: 8, 32>}, {pipeline_mode = #tpu.pipeline_mode<synchronous>, transform_indices = @transform_2, window_bounds = array<i64: 1, 32>}, {pipeline_mode = #tpu.pipeline_mode<synchronous>, transform_indices = @transform_3, window_bounds = array<i64: 1, 32>}, {transform_indices = @transform_4, window_bounds = array<i64: 1, 8, 32>}]} {
    %c0 = arith.constant 0 : index
    %c0_0 = arith.constant 0 : index
    %c0_1 = arith.constant 0 : index
    %0 = vector.load %arg2[%c0, %c0_0, %c0_1] : memref<1x8x32xf32, #tpu.memory_space<vmem>>, vector<1x8x32xf32>
    %1 = vector.shape_cast %0 : vector<1x8x32xf32> to vector<8x32xf32>
    %c0_2 = arith.constant 0 : index
    %c0_3 = arith.constant 0 : index
    %2 = vector.load %arg3[%c0_2, %c0_3] : memref<8x32xf32, #tpu.memory_space<vmem>>, vector<8x32xf32>
    %3 = arith.addf %1, %2 : vector<8x32xf32>
    %cst = arith.constant dense<0.000000e+00> : vector<8xf32>
    %4 = vector.multi_reduction <add>, %3, %cst [1] : vector<8x32xf32> to vector<8xf32>
    %5 = vector.shape_cast %4 : vector<8xf32> to vector<8x1xf32>
    %cst_4 = arith.constant 3.200000e+01 : f32
    %6 = vector.broadcast %cst_4 : f32 to vector<8x1xf32>
    %7 = arith.divf %5, %6 : vector<8x1xf32>
    %8 = vector.broadcast %7 : vector<8x1xf32> to vector<8x32xf32>
    %9 = arith.subf %3, %8 : vector<8x32xf32>
    %10 = arith.mulf %9, %9 : vector<8x32xf32>
    %cst_5 = arith.constant dense<0.000000e+00> : vector<8xf32>
    %11 = vector.multi_reduction <add>, %10, %cst_5 [1] : vector<8x32xf32> to vector<8xf32>
    %12 = vector.shape_cast %11 : vector<8xf32> to vector<8x1xf32>
    %cst_6 = arith.constant 3.200000e+01 : f32
    %13 = vector.broadcast %cst_6 : f32 to vector<8x1xf32>
    %14 = arith.divf %12, %13 : vector<8x1xf32>
    %15 = vector.broadcast %7 : vector<8x1xf32> to vector<8x32xf32>
    %16 = arith.subf %3, %15 : vector<8x32xf32>
    %cst_7 = arith.constant 9.99999974E-6 : f32
    %17 = vector.broadcast %cst_7 : f32 to vector<8x1xf32>
    %18 = arith.addf %14, %17 : vector<8x1xf32>
    %19 = math.rsqrt %18 : vector<8x1xf32>
    %20 = vector.broadcast %19 : vector<8x1xf32> to vector<8x32xf32>
    %21 = arith.mulf %16, %20 : vector<8x32xf32>
    %c0_8 = arith.constant 0 : index
    %c0_9 = arith.constant 0 : index
    %22 = vector.load %arg4[%c0_8, %c0_9] : memref<1x32xf32, #tpu.memory_space<vmem>>, vector<1x32xf32>
    %23 = vector.broadcast %22 : vector<1x32xf32> to vector<8x32xf32>
    %24 = arith.mulf %21, %23 : vector<8x32xf32>
    %c0_10 = arith.constant 0 : index
    %c0_11 = arith.constant 0 : index
    %25 = vector.load %arg5[%c0_10, %c0_11] : memref<1x32xf32, #tpu.memory_space<vmem>>, vector<1x32xf32>
    %26 = vector.broadcast %25 : vector<1x32xf32> to vector<8x32xf32>
    %27 = arith.addf %24, %26 : vector<8x32xf32>
    %28 = arith.truncf %27 : vector<8x32xf32> to vector<8x32xbf16>
    %c0_12 = arith.constant 0 : index
    %c0_13 = arith.constant 0 : index
    %c0_14 = arith.constant 0 : index
    %29 = vector.load %arg6[%c0_12, %c0_13, %c0_14] : memref<1x8x32xbf16, #tpu.memory_space<vmem>>, vector<1x8x32xbf16>
    %30 = vector.shape_cast %29 : vector<1x8x32xbf16> to vector<8x32xbf16>
    %31 = vector.shape_cast %28 : vector<8x32xbf16> to vector<1x8x32xbf16>
    tpu.vector_store %arg6[%c0_12, %c0_13, %c0_14], %31 {strides = array<i32>} : memref<1x8x32xbf16, #tpu.memory_space<vmem>>, vector<1x8x32xbf16>,
    return
  }
  func.func @transform_0(%arg0: i32, %arg1: i32) -> (i32, i32, i32) {
    %c0_i32 = arith.constant 0 : i32
    %c0_i32_0 = arith.constant 0 : i32
    return %arg0, %arg1, %c0_i32 : i32, i32, i32
  }
  func.func @transform_1(%arg0: i32, %arg1: i32) -> (i32, i32) {
    %c0_i32 = arith.constant 0 : i32
    %c0_i32_0 = arith.constant 0 : i32
    return %arg1, %c0_i32 : i32, i32
  }
  func.func @transform_2(%arg0: i32, %arg1: i32) -> (i32, i32) {
    %c0_i32 = arith.constant 0 : i32
    %c0_i32_0 = arith.constant 0 : i32
    %c0_i32_1 = arith.constant 0 : i32
    return %c0_i32, %c0_i32_0 : i32, i32
  }
  func.func @transform_3(%arg0: i32, %arg1: i32) -> (i32, i32) {
    %c0_i32 = arith.constant 0 : i32
    %c0_i32_0 = arith.constant 0 : i32
    %c0_i32_1 = arith.constant 0 : i32
    return %c0_i32, %c0_i32_0 : i32, i32
  }
  func.func @transform_4(%arg0: i32, %arg1: i32) -> (i32, i32, i32) {
    %c0_i32 = arith.constant 0 : i32
    %c0_i32_0 = arith.constant 0 : i32
    return %arg0, %arg1, %c0_i32 : i32, i32, i32
  }
}

</mosaic_0001>

<bundles_post_ra>
// kernel: tpu_custom_call.1
= control target key start
LH: loop header
LB: loop body
LE: loop exit
PB: predicated region body
PF: predicated region fallthrough
CT: control target
= control target key end

     0   :  { %9 = vsyncpa [#allocation3], 0  ;;  %s837_s0 = inlined_call_operand.hbm [shape: f32[2,8,32], index: 0, kind: input, shape index: {}]   ;;  %s838_s1 = inlined_call_operand.hbm [shape: f32[8,32], index: 1, kind: input, shape index: {}]   ;;  %s839_s2 = inlined_call_operand.vmem [shape: f32[1,32], index: 2, kind: input, shape index: {}]   ;;  %s840_s3 = inlined_call_operand.vmem [shape: f32[1,32], index: 3, kind: input, shape index: {}]   ;;  %s841_s4 = inlined_call_operand.hbm [shape: bf16[2,8,32], index: 4, kind: output, shape index: {}]  }
   0x1   :  { %11 = vsyncpa [#allocation3 + $0x1], 0 }
   0x2   :  { %12 = vsyncpa [#allocation6], 0 }
   0x3   :  { %13 = vsyncpa [#allocation4], 0 }
   0x4   :  { %15 = vsyncpa [#allocation4 + $0x1], 0  ;;  %s679_s15 = smov 0   ;;  %s681_s16 = smov 0  }
   0x5   :  { %s683_s17 = smov 0   ;;  %s685_s18 = smov 0  }
   0x6   :  { %s687_s19 = smov 0   ;;  %s689_s20 = smov 0  }
   0x7 LB: > { %s409_s21 = sadd.s32 4294967295, %s650_s20   ;;  %s410_s22 = sadd.s32 4294967294, %s650_s20   ;;  %s650_s20 = sphi %s689_s20, %s21_s20   ;;  %s646_s19 = sphi %s687_s19, %s853_s19   ;;  %s642_s18 = sphi %s685_s18, %s852_s18   ;;  %s638_s17 = sphi %s683_s17, %s851_s17   ;;  %s634_s16 = sphi %s681_s16, %s850_s16   ;;  %s630_s15 = sphi %s679_s15, %s849_s15  }
   0x8   : > { %p55_p0 = scmp.ne.s32.totalorder %s634_s16, %s630_s15  ;;  %p713_p1 = scmp.eq.s32.totalorder %s409_s21, 0 }
   0x9   : > { %p717_p2 = scmp.eq.s32.totalorder %s409_s21, 1  ;;  %p155_p3 = scmp.eq.s32.totalorder %s410_s22, 1 }
   0xa   : > { %p723_p4 = por %p713_p1, %p55_p0  ;;  %p411_p5 = scmp.ge.s32.totalorder %s650_s20, 1 }
   0xb   : > { %p728_p6 = por %p155_p3, %p55_p0  ;;  %p162_p7 = scmp.lt.s32.totalorder %s650_s20, 3 }
   0xc   : > { %s176_s29 = sshll.u32 %s838_s1, 4  ;;  %p413_p9 = scmp.ge.s32.totalorder %s650_s20, 2  ;;  %s177_s29 = int_to_ptr.hbm [resolvable:$true] %s176_s29 }
   0xd   : > { %p736_p8 = pnand %p411_p5, %p162_p7  ;;  %s652_s5 = smov [#allocation5]  }
   0xe   : > { %s178_s6 = sshll.u32 %s652_s5, 4  ;;  %s33_s7 = sadd.s32 1, %s646_s19  ;;  %s179_s6 = int_to_ptr.vmem [resolvable:$true] %s178_s6 }
   0xf   : > { %p432_p10 = pneg %p736_p8  ;;  %p35_p12 = scmp.ge.s32.totalorder %s33_s7, 2 }
  0x10   : > { %s42_s8 = sadd.s32 1, %s638_s17  ;;  %p49_p13 = scmp.ne.s32.totalorder %s638_s17, %s634_s16 }
  0x11   : > { %p433_p11 = pnand %p432_p10, %p713_p1  ;;  %p50_p0 = scmp.eq.s32.totalorder %s650_s20, 0 }
  0x12   : > { %s855_s7 = smov (%p35_p12, %s33_s7), 0  ;;  %p758_p5 = por %p717_p2, %p49_p13 }
  0x13   : > { %435 = dma.hbm_to_vmem [thread:$0]  (!%p433_p11), %s177_s29, 128, %s179_s6, [#allocation6]  }
  0x14   : > { %p752_p3 = por %p50_p0, %p49_p13  ;;  %s37_s11 = ssub.s32 %s646_s19, %s855_s7 }
  0x15   : > { %p445_p7 = scmp.lt.s32.totalorder %s650_s20, 2  ;;  %p40_p10 = scmp.eq.s32.totalorder %s37_s11, 0 }
  0x16   : > { %s195_s12 = sand.u32 1, %s638_s17   ;;  %s415_s21 = sshll.u32 %s646_s19, 3 }
  0x17   : > { %s414_s13 = sshll.u32 %s195_s12, 3  ;;  %s204_s28 = scalar_lea.hbm %s837_s0, %s415_s21 }
  0x18   : > { %s767_s14 = scalar_select %p40_p10, %s638_s17, %s42_s8  }
  0x19   : > { %s199_s29 = scalar_lea.vmem [#allocation2], %s414_s13  ;;  %s206_s24 = sshll.u32 %s204_s28, 4  ;;  %s207_s24 = int_to_ptr.hbm [resolvable:$true] %s206_s24 }
  0x1a   : > { %s208_s5 = sshll.u32 %s199_s29, 4  ;;  %p437_p2 = pnand %p445_p7, %p752_p3  ;;  %s209_s5 = int_to_ptr.vmem [resolvable:$true] %s208_s5 }
  0x1b   : > { %s196_s6 = scalar_lea.sflag [#allocation3], %s195_s12  ;;  %217 = sbr.rel (%p736_p8) target bundleno = 311 (0x137), region = 36 }
  0x1c   : > { %439 = dma.hbm_to_vmem [thread:$0]  (!%p437_p2), %s207_s24, 128, %s209_s5, %s196_s6  }
  0x1d   : > { %s778_s8 = sand.u32 (!%p736_p8), 1, %s634_s16  }
  0x1e   : > { %s417_s11 = sshll.u32 (!%p736_p8), %s778_s8, 3  ;;  %s220_s21 = scalar_lea.sflag (!%p736_p8), [#allocation3], %s778_s8 }
  0x1f   : > { %s223_s13 = scalar_lea.vmem (!%p736_p8), [#allocation2], %s417_s11 }
  0x20   : > { %617 = dma.done.wait (%p723_p4), %s220_s21, 128  }
  0x21   : > { %619 = vsyncadd (%p723_p4), %s220_s21, 4294967168 }
  0x22   : > { %621 = dma.done.wait (%p713_p1), [#allocation6], 128  }
  0x23   : > { %623 = vsyncadd (%p713_p1), [#allocation6], 4294967168  ;;  %v254_v0 = vld [vmem:[%s223_s13] sm:$0xff]  ;;  %v255_v1 = vld [vmem:[#allocation5] sm:$0xff]  ;;  %vm257_vm0 = vcmask 261120   ;;  %v653_v4 = vmov 32.0  }
  0x24   : > { %v256_v2 = vadd.f32 %v255_v1, %v254_v0  ;;  %500 = vrcp.f32 %v653_v4  ;;  %s419_s23 = sshll.u32 %s778_s8, 2  ;;  %s421_s25 = sshll.u32 %s642_s18, 2  ;;  %v498_v25 = vld [vmem:[%s839_s2] ss:$0 sm:$0xff]  ;;  %vm298_vm5 = vcmask 257024  }
  0x25   : > { %v499_v27 = vld [vmem:[%s840_s3] ss:$0 sm:$0xff]  ;;  %s312_s29 = scalar_lea.hbm %s841_s4, %s421_s25  ;;  %s253_s5 = scalar_lea.vmem [#allocation7], %s419_s23 }
  0x26   : > { %v258_v3 = vsel %vm257_vm0, %v256_v2, 0.0  ;;  %s314_s18 = sshll.u32 %s253_s5, 4  ;;  %s316_s24 = sshll.u32 %s312_s29, 4  ;;  %s315_s18 = int_to_ptr.vmem [resolvable:$true] %s314_s18  ;;  %s317_s24 = int_to_ptr.hbm [resolvable:$true] %s316_s24 }
  0x27   : > { %259 = vadd.xlane.f32.xlu0 %v258_v3  ;;  %s301_s6 = scalar_lea.sflag [#allocation4], %s778_s8  ;;  %s578_s11 = sshra.s32 %s317_s24, 4  ;;  %s579_s11 = int_to_ptr.hbm [resolvable:$true] %s578_s11 }
  0x28   : > { %s580_s21 = scalar_lea.hbm %s579_s11, 4  ;;  %s584_s23 = scalar_lea.hbm %s841_s4, 8 }
  0x29   : > { %p581_p1 = scmp.ne.s32.totalorder %s579_s11, %s580_s21  ;;  %p585_p11 = scmp.lt.s32.totalorder %s579_s11, %s841_s4 }
  0x2a   : > { %v501_v5 = vpop.eup %500  ;;  %p586_p12 = scmp.lt.s32.totalorder %s584_s23, %s580_s21 }
  0x2b   : > { %v262_v6 = vmul.f32 32.0, %v501_v5  ;;  %vm266_vm1 = vweird.f32 %v501_v5  ;;  %p582_p4 = pnand %p581_p1, %p758_p5 }
  0x2c   : > { %p587_p13 = por %p586_p12, %p585_p11 }
  0x2d   : > { %v263_v7 = vsub.f32 1.0, %v262_v6  ;;  %p583_p8 = pneg %p582_p4 }
  0x2f   : > { %v264_v8 = vmul.f32 %v501_v5, %v263_v7  ;;  %p588_p0 = pnand %p587_p13, %p583_p8 }
  0x31   : > { %v265_v9 = vadd.f32 %v501_v5, %v264_v8 }
  0x33   : > { %v267_v10 = vsel %vm266_vm1, %v501_v5, %v265_v9 }
  0x9a   : > { %v260_v11 = vpop.xlane.xlu0 %259 }
  0x9b   : > { %v268_v12 = vmul.f32 %v267_v10, %v260_v11 }
  0x9d   : > { %v269_v13 = vsub.f32 %v256_v2, %v268_v12 }
  0x9f   : > { %v270_v14 = vmul.f32 %v269_v13, %v269_v13 }
  0xa1   : > { %v271_v15 = vsel %vm257_vm0, %v270_v14, 0.0 }
  0xa2   : > { %272 = vadd.xlane.f32.xlu0 %v271_v15 }
 0x115   : > { %v273_v16 = vpop.xlane.xlu0 %272 }
 0x116   : > { %v274_v17 = vmul.f32 %v273_v16, %v267_v10 }
 0x118   : > { %v275_v18 = vadd.f32 1e-05, %v274_v17 }
 0x11a   : > { %502 = vrsqrt.f32 %v275_v18  ;;  %vm282_vm3 = vweird.f32 %v275_v18 }
 0x120   : > { %v503_v19 = vpop.eup %502 }
 0x121   : > { %v277_v20 = vmul.f32 %v503_v19, %v275_v18  ;;  %vm283_vm2 = vweird.f32 %v503_v19 }
 0x122   : > { %vm284_vm4 = vmor %vm282_vm3, %vm283_vm2 }
 0x123   : > { %v278_v21 = vmul.f32 %v503_v19, %v277_v20 }
 0x125   : > { %v279_v22 = vmul.f32 0.5, %v278_v21 }
 0x127   : > { %v280_v23 = vsub.f32 1.5, %v279_v22 }
 0x129   : > { %v281_v24 = vmul.f32 %v503_v19, %v280_v23 }
 0x12b   : > { %v285_v26 = vsel %vm284_vm4, %v503_v19, %v281_v24 }
 0x12c   : > { %v286_v28 = vmul.f32 %v285_v26, %v269_v13 }
 0x12e   : > { %v291_v29 = vmul.f32 %v498_v25, %v286_v28 }
 0x130   : > { %v296_v30 = vadd.f32 %v499_v27, %v291_v29 }
 0x132   : > { %v297_v31 = vpack.c.bf16 %v296_v30, %v296_v30 }
 0x134   : > { %299 = vst.msk [vmem:[%s253_s5] sm:$0xf] %vm298_vm5, %v297_v31 }
 0x135   : > { %591 = shalt.err (!%p588_p0)
}
 0x136   : > { %430 = dma.vmem_to_hbm [thread:$0]  (%p758_p5), %s315_s18, 64, %s317_s24, %s301_s6  }
 0x137 PF: > { %s328_s8 = sand.u32 1, %s630_s15   ;;  %p441_p3 = pnand %p413_p9, %p728_p6 }
 0x138   : > { %s329_s12 = scalar_lea.sflag [#allocation4], %s328_s8 }
 0x139   : > { %p442_p7 = pneg %p441_p3 }
 0x13b   : > { %625 = dma.done.wait (%p442_p7), %s329_s12, 64  }
 0x13c   : > { %627 = vsyncadd (%p442_p7), %s329_s12, 4294967232  ;;  %s21_s20 = sadd.s32 1, %s650_s20   ;;  %s849_s15 = smov %s634_s16 }
 0x13d   : > { %p18_p10 = scmp.ge.s32.totalorder %s21_s20, 4   ;;  %s850_s16 = smov %s638_s17 }
 0x13e   : > { %s851_s17 = smov %s767_s14  ;;  %s852_s18 = smov %s646_s19 }
 0x13f   : > { %s853_s19 = smov %s855_s7  ;;  %20 = sbr.rel (!%p18_p10) target bundleno = 7 (0x7), region = 86 }
 0x144   :  { %335 = vsyncpa [#allocation3], 1 }
 0x145   :  { %337 = vsyncpa [#allocation3 + $0x1], 1 }
 0x146   :  { %338 = vsyncpa [#allocation6], 1 }
 0x147   :  { %339 = vsyncpa [#allocation4], 1 }
 0x148   :  { %341 = vsyncpa [#allocation4 + $0x1], 1 }

</bundles_post_ra>
